<compile_context>
chip_gen: v7x
topology: tpu7x:2x2x1
jax: 0.10.0
libtpu: 0.0.40
codegen_flags: <defaults>
</compile_context>

<pallas_src>
import functools

import jax
import jax.numpy as jnp
from jax.experimental import pallas as pl
from jax.experimental.pallas import tpu as pltpu

VMEM_LIMIT = 64 * 1024 * 1024


def _round_up(x, m):
    return (x + m - 1) // m * m


# ----------------------------------------------------------------------------
# Generic fused matmul kernel: optional BN+ReLU prologue on A, optional
# affine(+ReLU|+sigmoid) epilogue on the f32 accumulator.
# ----------------------------------------------------------------------------
def _make_matmul_kernel(k_steps, has_prologue, epi_act):
    def kernel(*refs):
        idx = 0
        a_ref, b_ref = refs[0], refs[1]
        idx = 2
        if has_prologue:
            ps_ref, pt_ref = refs[idx], refs[idx + 1]
            idx += 2
        if epi_act is not None:
            es_ref, et_ref = refs[idx], refs[idx + 1]
            idx += 2
        o_ref = refs[idx]
        idx += 1
        acc_ref = refs[idx] if k_steps > 1 else None

        a = a_ref[...]
        if has_prologue:
            # fused eval-mode BatchNorm + ReLU on the A operand (f32 math)
            a = jnp.maximum(a.astype(jnp.float32) * ps_ref[...] + pt_ref[...], 0.0)
        part = jnp.dot(a.astype(jnp.bfloat16), b_ref[...],
                       preferred_element_type=jnp.float32)

        def _finish(acc):
            y = acc
            if epi_act is not None:
                y = y * es_ref[...] + et_ref[...]
                if epi_act == "relu":
                    y = jnp.maximum(y, 0.0)
                else:  # "sigmoid"
                    y = jax.nn.sigmoid(y)
            o_ref[...] = y.astype(o_ref.dtype)

        if k_steps > 1:
            @pl.when(pl.program_id(2) == 0)
            def _():
                acc_ref[...] = jnp.zeros_like(acc_ref)

            acc_ref[...] += part

            @pl.when(pl.program_id(2) == k_steps - 1)
            def _():
                _finish(acc_ref[...])
        else:
            _finish(part)

    return kernel


def _choose_tiles(mp, kp, np_):
    # Full-K single-step whenever K fits (<=1024): B panel VMEM-resident, no
    # accumulator scratch, no K-step overhead.  kp is always a multiple of 128.
    if kp <= 1024:
        tk = kp
    else:
        tk = next(t for t in (1024, 896, 768, 640, 512, 384, 256, 128)
                  if kp % t == 0)
    # Full-N block (N <= 512 everywhere here): prologue runs once per A element
    # and v6e/v7x's 256-wide MXU gets a full panel.
    tn = np_ if np_ <= 512 else (256 if np_ % 256 == 0 else 128)
    # Large TM to amortize per-grid-step overhead, budgeted against VMEM.
    tm = next(t for t in (1024, 512, 256, 128, 64, 32, 16) if mp % t == 0)

    def ws(tm_):  # double-buffered A, B, out + f32 accumulator
        return (2 * tm_ * tk * 2 + 2 * tk * tn * 2 + 2 * tm_ * tn * 2
                + tm_ * tn * 4)

    while tm > 16 and ws(tm) > 12 * 1024 * 1024:
        tm //= 2
    return tm, tn, tk


@functools.lru_cache(maxsize=None)
def _matmul_call(mp, np_, k_size, tm, tn, tk, has_prologue, epi_act, out_dtype):
    k_steps = k_size // tk
    kern = _make_matmul_kernel(k_steps, has_prologue, epi_act)
    in_specs = [pl.BlockSpec((tm, tk), lambda i, j, k: (i, k)),
                pl.BlockSpec((tk, tn), lambda i, j, k: (k, j))]
    if has_prologue:
        in_specs.append(pl.BlockSpec((1, tk), lambda i, j, k: (0, k)))
        in_specs.append(pl.BlockSpec((1, tk), lambda i, j, k: (0, k)))
    if epi_act is not None:
        in_specs.append(pl.BlockSpec((1, tn), lambda i, j, k: (0, j)))
        in_specs.append(pl.BlockSpec((1, tn), lambda i, j, k: (0, j)))
    scratch = [pltpu.VMEM((tm, tn), jnp.float32)] if k_steps > 1 else []
    return jax.jit(pl.pallas_call(
        kern,
        out_shape=jax.ShapeDtypeStruct((mp, np_), out_dtype),
        grid_spec=pltpu.PrefetchScalarGridSpec(
            num_scalar_prefetch=0,
            grid=(mp // tm, np_ // tn, k_steps),
            in_specs=in_specs,
            out_specs=pl.BlockSpec((tm, tn), lambda i, j, k: (i, j)),
            scratch_shapes=scratch),
        compiler_params=pltpu.CompilerParams(
            dimension_semantics=("parallel", "parallel", "arbitrary"),
            vmem_limit_bytes=VMEM_LIMIT),
    ))


def conv_gemm(a, w_p, k_size, *, prologue=None, epilogue=None,
              out_dtype=jnp.bfloat16):
    """a: (M, Ka) bf16 (only the first k_size columns are read when Ka > k_size);
    w_p: (k_size, Np) bf16, pre-padded at prepare time.
    prologue = (scale, shift): ReLU(a*scale+shift) fused on the A operand (f32 math).
    epilogue = (scale, shift, act): applied to the f32 accumulator before store."""
    m, ka = a.shape
    mp = _round_up(m, 16)
    if mp != m:
        a = jnp.pad(a, ((0, mp - m), (0, 0)))
    if ka < k_size:
        a = jnp.pad(a, ((0, 0), (0, k_size - ka)))
    np_ = w_p.shape[1]
    tm, tn, tk = _choose_tiles(mp, k_size, np_)
    epi_act = None if epilogue is None else epilogue[2]
    call = _matmul_call(mp, np_, k_size, tm, tn, tk,
                        prologue is not None, epi_act, out_dtype)
    args = [a, w_p]
    if prologue is not None:
        args += [prologue[0], prologue[1]]
    if epilogue is not None:
        args += [epilogue[0], epilogue[1]]
    return call(*args)


# ----------------------------------------------------------------------------
# Fused dense-layer kernel:
#   y1 = relu(bn2(conv1x1(relu(bn1(buf[:, :k1])))))       (kept in VMEM scratch)
#   y2 = conv3x3_pad1(y1)                                  (9 masked shifted matmuls)
# ----------------------------------------------------------------------------
def _make_dense_layer_kernel(mp, hh, ww, pad):
    hw = hh * ww
    taps = [(di, dj) for di in (-1, 0, 1) for dj in (-1, 0, 1)]

    def kernel(a_ref, w1_ref, s1_ref, t1_ref, s2_ref, t2_ref, w2_ref,
               o_ref, y1_ref):
        # 1x1 conv with fused norm1+ReLU prologue and norm2+ReLU epilogue.
        a = a_ref[...].astype(jnp.float32)
        a = jnp.maximum(a * s1_ref[...] + t1_ref[...], 0.0)
        y1 = jnp.dot(a.astype(jnp.bfloat16), w1_ref[...],
                     preferred_element_type=jnp.float32)
        y1 = jnp.maximum(y1 * s2_ref[...] + t2_ref[...], 0.0)
        y1_ref[pad:pad + mp, :] = y1.astype(jnp.bfloat16)

        # Per-row spatial coordinates for the 3x3 tap validity masks.
        r = jax.lax.broadcasted_iota(jnp.int32, (mp, 1), 0)
        rem = r % hw
        ii = rem // ww
        jj = rem % ww

        acc = jnp.zeros((mp, 128), jnp.float32)
        for t, (di, dj) in enumerate(taps):
            off = di * ww + dj
            shifted = y1_ref[pad + off:pad + off + mp, :]
            valid = ((ii + di >= 0) & (ii + di < hh) &
                     (jj + dj >= 0) & (jj + dj < ww))
            shifted = jnp.where(valid, shifted, jnp.zeros_like(shifted))
            acc = acc + jnp.dot(shifted, w2_ref[t * 128:(t + 1) * 128, :],
                                preferred_element_type=jnp.float32)
        o_ref[...] = acc.astype(o_ref.dtype)

    return kernel


@functools.lru_cache(maxsize=None)
def _dense_layer_call(mp, k1p, hh, ww):
    pad = _round_up(ww + 1, 8)
    kern = _make_dense_layer_kernel(mp, hh, ww, pad)
    return jax.jit(pl.pallas_call(
        kern,
        out_shape=jax.ShapeDtypeStruct((mp, 128), jnp.bfloat16),
        grid_spec=pltpu.PrefetchScalarGridSpec(
            num_scalar_prefetch=0,
            grid=(1,),
            in_specs=[
                pl.BlockSpec((mp, k1p), lambda i: (0, 0)),       # buf (live K cols)
                pl.BlockSpec((k1p, 128), lambda i: (0, 0)),      # w1
                pl.BlockSpec((1, k1p), lambda i: (0, 0)),        # norm1 scale
                pl.BlockSpec((1, k1p), lambda i: (0, 0)),        # norm1 shift
                pl.BlockSpec((1, 128), lambda i: (0, 0)),        # norm2 scale
                pl.BlockSpec((1, 128), lambda i: (0, 0)),        # norm2 shift
                pl.BlockSpec((9 * 128, 128), lambda i: (0, 0)),  # w2 (9 taps)
            ],
            out_specs=pl.BlockSpec((mp, 128), lambda i: (0, 0)),
            scratch_shapes=[pltpu.VMEM((mp + 2 * pad, 128), jnp.bfloat16)]),
        compiler_params=pltpu.CompilerParams(
            dimension_semantics=("arbitrary",),
            vmem_limit_bytes=VMEM_LIMIT),
    ))


def _fused_layer_bytes(mp, k1p, ww):
    pad = _round_up(ww + 1, 8)
    return (2 * mp * k1p * 2          # A in (double buffered)
            + mp * k1p * 6            # f32 + bf16 prologue temps
            + (mp + 2 * pad) * 128 * 2  # y1 scratch
            + mp * 128 * 4            # conv2 f32 accumulator
            + 2 * mp * 128 * 2        # out (double buffered)
            + k1p * 128 * 2 + 9 * 128 * 128 * 2)


# ----------------------------------------------------------------------------
# Fused norm5 + ReLU + global average pool kernel
# ----------------------------------------------------------------------------
def _gap_kernel(x_ref, s_ref, t_ref, o_ref):
    x = x_ref[...].astype(jnp.float32)                  # (tb, HW, C)
    y = jnp.maximum(x * s_ref[...] + t_ref[...], 0.0)   # BN + ReLU in f32
    o_ref[...] = jnp.mean(y, axis=1)


@functools.lru_cache(maxsize=None)
def _gap_call(nb, tb, hw, cp):
    return jax.jit(pl.pallas_call(
        _gap_kernel,
        out_shape=jax.ShapeDtypeStruct((nb, cp), jnp.float32),
        grid_spec=pltpu.PrefetchScalarGridSpec(
            num_scalar_prefetch=0,
            grid=(nb // tb,),
            in_specs=[pl.BlockSpec((tb, hw, cp), lambda i: (i, 0, 0)),
                      pl.BlockSpec((1, cp), lambda i: (0, 0)),
                      pl.BlockSpec((1, cp), lambda i: (0, 0))],
            out_specs=pl.BlockSpec((tb, cp), lambda i: (i, 0))),
        compiler_params=pltpu.CompilerParams(
            dimension_semantics=("parallel",),
            vmem_limit_bytes=VMEM_LIMIT),
    ))


def gap_norm_relu(x_flat, norm5):
    """x_flat: (N, H*W, C) bf16 -> (N, C) f32 = mean_hw(relu(x*scale+shift))."""
    nb, hw, c = x_flat.shape
    cp = _round_up(c, 128)
    if cp != c:
        x_flat = jnp.pad(x_flat, ((0, 0), (0, 0), (0, cp - c)))
    tb = 8 if nb % 8 == 0 else nb
    out = _gap_call(nb, tb, hw, cp)(x_flat, norm5[0], norm5[1])
    return out[:, :c]


# ----------------------------------------------------------------------------
# Conv / pooling glue (im2col for the stem, strided-slice max/avg pool)
# ----------------------------------------------------------------------------
def _im2col(x, kh, kw, stride, padding):
    """x: (N,H,W,Cin) bf16 -> (N*Ho*Wo, kh*kw*Cin) bf16 patches."""
    n, h, w, cin = x.shape
    xp = jnp.pad(x, ((0, 0), (padding, padding), (padding, padding), (0, 0)))
    hp, wp = h + 2 * padding, w + 2 * padding
    ho = (hp - kh) // stride + 1
    wo = (wp - kw) // stride + 1
    cols = []
    for i in range(kh):
        for j in range(kw):
            cols.append(xp[:, i:i + stride * ho:stride,
                           j:j + stride * wo:stride, :])
    patches = jnp.concatenate(cols, axis=-1).reshape(n * ho * wo, kh * kw * cin)
    return patches, (n, ho, wo)


def maxpool_3x3_s2_p1(x):
    xp = jnp.pad(x, ((0, 0), (1, 1), (1, 1), (0, 0)),
                 constant_values=-jnp.inf)
    n, hp, wp, c = xp.shape
    ho = (hp - 3) // 2 + 1
    wo = (wp - 3) // 2 + 1
    out = None
    for i in range(3):
        for j in range(3):
            v = xp[:, i:i + 2 * ho:2, j:j + 2 * wo:2, :]
            out = v if out is None else jnp.maximum(out, v)
    return out


def avgpool_2x2_s2(x):
    # torchvision AvgPool2d(2,2) floors odd spatial dims -> crop before pooling.
    n, h, w, c = x.shape
    ho, wo = h // 2, w // 2
    x = x[:, :2 * ho, :2 * wo, :]
    s = (x[:, 0::2, 0::2, :].astype(jnp.float32)
         + x[:, 0::2, 1::2, :].astype(jnp.float32)
         + x[:, 1::2, 0::2, :].astype(jnp.float32)
         + x[:, 1::2, 1::2, :].astype(jnp.float32))
    return (s * 0.25).astype(jnp.bfloat16)


# ----------------------------------------------------------------------------
# Parameter construction (torch layout) and one-time preparation (matmul layout)
# ----------------------------------------------------------------------------
def _he_conv(key, cout, cin, kh, kw):
    fan_in = cin * kh * kw
    return jax.random.normal(key, (cout, cin, kh, kw), jnp.float32) * jnp.sqrt(
        2.0 / fan_in)


def _bn_params(c):
    # (gamma, beta, running_mean, running_var) — torch defaults, eval mode
    return (jnp.ones((c,), jnp.float32), jnp.zeros((c,), jnp.float32),
            jnp.zeros((c,), jnp.float32), jnp.ones((c,), jnp.float32))


def init_densenet121_params(key, out_size, growth_rate=32,
                            block_config=(6, 12, 24, 16),
                            num_init_features=64, bn_size=4):
    keys = iter(jax.random.split(key, 256))
    params = {
        "conv0": _he_conv(next(keys), num_init_features, 3, 7, 7),
        "norm0": _bn_params(num_init_features),
        "blocks": [],
        "transitions": [],
    }
    num_features = num_init_features
    for bi, num_layers in enumerate(block_config):
        layers = []
        for li in range(num_layers):
            in_ch = num_features + li * growth_rate
            layers.append({
                "norm1": _bn_params(in_ch),
                "conv1": _he_conv(next(keys), bn_size * growth_rate, in_ch, 1, 1),
                "norm2": _bn_params(bn_size * growth_rate),
                "conv2": _he_conv(next(keys), growth_rate,
                                  bn_size * growth_rate, 3, 3),
            })
        params["blocks"].append(layers)
        num_features += num_layers * growth_rate
        if bi != len(block_config) - 1:
            params["transitions"].append({
                "norm": _bn_params(num_features),
                "conv": _he_conv(next(keys), num_features // 2,
                                 num_features, 1, 1),
            })
            num_features //= 2
    params["norm5"] = _bn_params(num_features)
    params["classifier"] = {
        "w": jax.random.normal(next(keys), (num_features, out_size),
                               jnp.float32) * jnp.sqrt(2.0 / num_features),
        "b": jnp.zeros((out_size,), jnp.float32),
    }
    return params


def prepare_params(params, eps=1e-5):
    """One-time conversion: weights -> padded bf16 (K, Cout) matrices; BN running
    stats folded into padded f32 (1, C) scale/shift vectors."""
    def prep_w(w):
        cout, cin, kh, kw = w.shape
        k = kh * kw * cin
        wm = jnp.transpose(w, (2, 3, 1, 0)).reshape(k, cout)
        kp, npad = _round_up(k, 128), _round_up(cout, 128)
        wm = jnp.pad(wm, ((0, kp - k), (0, npad - cout))).astype(jnp.bfloat16)
        return wm, kp, cout

    def prep_bn(bn, pad_to):
        gamma, beta, mean, var = bn
        s = gamma * jax.lax.rsqrt(var + eps)
        t = beta - mean * s
        s = jnp.pad(s, (0, pad_to - s.shape[0])).reshape(1, pad_to)
        t = jnp.pad(t, (0, pad_to - t.shape[0])).reshape(1, pad_to)
        return s.astype(jnp.float32), t.astype(jnp.float32)

    prep = {}
    w0, k0, c0 = prep_w(params["conv0"])
    prep["conv0"] = dict(w=w0, k=k0, cout=c0,
                         epi=prep_bn(params["norm0"], _round_up(c0, 128)))

    prep["blocks"] = []
    for block in params["blocks"]:
        layers = []
        for layer in block:
            w1, k1, c1 = prep_w(layer["conv1"])
            w2, k2, c2 = prep_w(layer["conv2"])
            layers.append(dict(
                w1=w1, k1=k1, c1=c1,
                pro1=prep_bn(layer["norm1"], k1),
                epi1=prep_bn(layer["norm2"], _round_up(c1, 128)),
                w2=w2, k2=k2, c2=c2))
        prep["blocks"].append(layers)

    prep["transitions"] = []
    for t in params["transitions"]:
        wt, kt, ct = prep_w(t["conv"])
        prep["transitions"].append(dict(w=wt, k=kt, cout=ct,
                                        pro=prep_bn(t["norm"], kt)))

    nf = params["classifier"]["w"].shape[0]
    prep["norm5"] = prep_bn(params["norm5"], _round_up(nf, 128))
    wc = params["classifier"]["w"]
    out_size = wc.shape[1]
    kcp, ncp = _round_up(nf, 128), _round_up(out_size, 128)
    prep["cls_w"] = jnp.pad(wc, ((0, kcp - nf),
                                 (0, ncp - out_size))).astype(jnp.bfloat16)
    prep["cls_k"] = kcp
    prep["cls_s"] = jnp.ones((1, ncp), jnp.float32)
    prep["cls_t"] = jnp.pad(params["classifier"]["b"],
                            (0, ncp - out_size)).reshape(1, ncp)
    prep["out_size"] = out_size
    return prep


# ----------------------------------------------------------------------------
# Forward pass (matches torchvision DenseNet121 + Linear+Sigmoid classifier)
# ----------------------------------------------------------------------------
def densenet121_forward(prep, x_nchw):
    x = jnp.transpose(x_nchw, (0, 2, 3, 1)).astype(jnp.bfloat16)  # NCHW -> NHWC

    # stem: conv0 7x7/2 pad3 with fused norm0+ReLU epilogue, then 3x3/2 maxpool
    c0 = prep["conv0"]
    patches, (n, h, w) = _im2col(x, 7, 7, 2, 3)
    y = conv_gemm(patches, c0["w"], c0["k"], epilogue=(*c0["epi"], "relu"))
    x = y[:n * h * w, :c0["cout"]].reshape(n, h, w, c0["cout"])
    x = maxpool_3x3_s2_p1(x)

    buf = None
    m = 0
    c_buf = 0
    for bi, layers in enumerate(prep["blocks"]):
        n, h, w, c_in = x.shape
        m = n * h * w
        mp = _round_up(m, 16)
        c_final = c_in + sum(l["c2"] for l in layers)
        c_buf = _round_up(c_final, 128)
        # preallocated 128-aligned channel buffer holding the whole dense block
        buf = jnp.zeros((mp, c_buf), jnp.bfloat16)
        buf = jax.lax.dynamic_update_slice(buf, x.reshape(m, c_in), (0, 0))
        ch = c_in
        for layer in layers:
            k1p = layer["k1"]
            if _fused_layer_bytes(mp, k1p, w) <= 40 * 1024 * 1024:
                # fused norm1+ReLU -> conv1 -> norm2+ReLU -> 3x3 conv2;
                # the bottleneck never leaves VMEM, no im2col.
                y2 = _dense_layer_call(mp, k1p, h, w)(
                    buf, layer["w1"], layer["pro1"][0], layer["pro1"][1],
                    layer["epi1"][0], layer["epi1"][1], layer["w2"])
            else:
                # fallback for very large M: unfused path (HBM y1 + im2col)
                y1 = conv_gemm(buf, layer["w1"], layer["k1"],
                               prologue=layer["pro1"],
                               epilogue=(*layer["epi1"], "relu"))
                h1 = y1[:m, :layer["c1"]].reshape(n, h, w, layer["c1"])
                p2, _ = _im2col(h1, 3, 3, 1, 1)
                y2 = conv_gemm(p2, layer["w2"], layer["k2"])
            # TODO(synk): lane-aligned slab writeback / input_output_aliases would
            # avoid this copy, but the 32-channel offsets are not 128-lane aligned.
            buf = jax.lax.dynamic_update_slice(buf, y2[:m, :layer["c2"]], (0, ch))
            ch += layer["c2"]
        if bi < len(prep["transitions"]):
            t = prep["transitions"][bi]
            # transition: norm+ReLU fused on the A operand of the 1x1 conv
            yt = conv_gemm(buf, t["w"], t["k"], prologue=t["pro"])
            x = yt[:m, :t["cout"]].reshape(n, h, w, t["cout"])
            x = avgpool_2x2_s2(x)

    # norm5 + ReLU + adaptive avg-pool (1,1), fused into one reduction kernel
    feats = buf[:m, :].reshape(n, h * w, c_buf)
    pooled = gap_norm_relu(feats, prep["norm5"])                 # (N, 1024) f32

    # classifier: Linear + Sigmoid, bias+sigmoid fused into the matmul epilogue
    logits = conv_gemm(pooled.astype(jnp.bfloat16), prep["cls_w"], prep["cls_k"],
                       epilogue=(prep["cls_s"], prep["cls_t"], "sigmoid"),
                       out_dtype=jnp.float32)
    return logits[:n, :prep["out_size"]]


# ----------------------------------------------------------------------------
if __name__ == "__main__":
    key = jax.random.PRNGKey(0)
    k_param, k_input = jax.random.split(key)

    OUT_SIZE = 14           # e.g. CheXNet-style multi-label head
    BATCH = 2
    # smallest spatial size that survives the /32 downsampling of DenseNet121
    x = jax.random.normal(k_input, (BATCH, 3, 32, 32), jnp.float32)

    params = init_densenet121_params(k_param, OUT_SIZE)
    prep = prepare_params(params)

    out = densenet121_forward(prep, x)
    out = jax.block_until_ready(out)

    assert out.shape == (BATCH, OUT_SIZE), out.shape
    assert bool(jnp.all(jnp.isfinite(out)))
    assert bool(jnp.all((out >= 0.0) & (out <= 1.0)))
    print("KERNEL_OK")
</pallas_src>

<mosaic_0001>
module attributes {stable_mosaic.version = 11 : i64} {
  func.func @kernel(%arg0: i32, %arg1: i32, %arg2: i32, %arg3: memref<512x256xbf16, #tpu.memory_space<vmem>>, %arg4: memref<256x128xbf16, #tpu.memory_space<vmem>>, %arg5: memref<1x128xf32, #tpu.memory_space<vmem>>, %arg6: memref<1x128xf32, #tpu.memory_space<vmem>>, %arg7: memref<512x128xbf16, #tpu.memory_space<vmem>>) attributes {dimension_semantics = [#tpu.dimension_semantics<parallel>, #tpu.dimension_semantics<parallel>, #tpu.dimension_semantics<arbitrary>], iteration_bounds = array<i64: 1, 1, 1>, scalar_prefetch = 0 : i64, scratch_operands = 0 : i64, tpu.core_type = #tpu.core_type<tc>, window_params = [{transform_indices = @transform_0, window_bounds = array<i64: 512, 256>}, {transform_indices = @transform_1, window_bounds = array<i64: 256, 128>}, {transform_indices = @transform_2, window_bounds = array<i64: 1, 128>}, {transform_indices = @transform_3, window_bounds = array<i64: 1, 128>}, {transform_indices = @transform_4, window_bounds = array<i64: 512, 128>}]} {
    %c0 = arith.constant 0 : index
    %c0_0 = arith.constant 0 : index
    %0 = vector.load %arg3[%c0, %c0_0] : memref<512x256xbf16, #tpu.memory_space<vmem>>, vector<512x256xbf16>
    %c0_1 = arith.constant 0 : index
    %c0_2 = arith.constant 0 : index
    %1 = vector.load %arg4[%c0_1, %c0_2] : memref<256x128xbf16, #tpu.memory_space<vmem>>, vector<256x128xbf16>
    %cst = arith.constant dense<0.000000e+00> : vector<512x128xf32>
    %2 = tpu.matmul %0, %1, %cst {dimension_numbers = #tpu.dot_dimension_numbers<[1], [0], [0], [1], [0, 0, 1, 1], [], []>} : vector<512x256xbf16>, vector<256x128xbf16>, vector<512x128xf32> -> vector<512x128xf32>
    %c0_3 = arith.constant 0 : index
    %c0_4 = arith.constant 0 : index
    %3 = vector.load %arg5[%c0_3, %c0_4] : memref<1x128xf32, #tpu.memory_space<vmem>>, vector<1x128xf32>
    %4 = vector.broadcast %3 : vector<1x128xf32> to vector<512x128xf32>
    %5 = arith.mulf %2, %4 : vector<512x128xf32>
    %c0_5 = arith.constant 0 : index
    %c0_6 = arith.constant 0 : index
    %6 = vector.load %arg6[%c0_5, %c0_6] : memref<1x128xf32, #tpu.memory_space<vmem>>, vector<1x128xf32>
    %7 = vector.broadcast %6 : vector<1x128xf32> to vector<512x128xf32>
    %8 = arith.addf %5, %7 : vector<512x128xf32>
    %cst_7 = arith.constant 0.000000e+00 : f32
    %9 = vector.broadcast %cst_7 : f32 to vector<512x128xf32>
    %10 = arith.maximumf %8, %9 : vector<512x128xf32>
    %11 = arith.truncf %10 : vector<512x128xf32> to vector<512x128xbf16>
    %c0_8 = arith.constant 0 : index
    %c0_9 = arith.constant 0 : index
    %12 = vector.load %arg7[%c0_8, %c0_9] : memref<512x128xbf16, #tpu.memory_space<vmem>>, vector<512x128xbf16>
    tpu.vector_store %arg7[%c0_8, %c0_9], %11 {strides = array<i32>} : memref<512x128xbf16, #tpu.memory_space<vmem>>, vector<512x128xbf16>,
    return
  }
  func.func @transform_0(%arg0: i32, %arg1: i32, %arg2: i32) -> (i32, i32) {
    %c0_i32 = arith.constant 0 : i32
    return %arg0, %arg2 : i32, i32
  }
  func.func @transform_1(%arg0: i32, %arg1: i32, %arg2: i32) -> (i32, i32) {
    %c0_i32 = arith.constant 0 : i32
    return %arg2, %arg1 : i32, i32
  }
  func.func @transform_2(%arg0: i32, %arg1: i32, %arg2: i32) -> (i32, i32) {
    %c0_i32 = arith.constant 0 : i32
    %c0_i32_0 = arith.constant 0 : i32
    return %c0_i32, %arg1 : i32, i32
  }
  func.func @transform_3(%arg0: i32, %arg1: i32, %arg2: i32) -> (i32, i32) {
    %c0_i32 = arith.constant 0 : i32
    %c0_i32_0 = arith.constant 0 : i32
    return %c0_i32, %arg1 : i32, i32
  }
  func.func @transform_4(%arg0: i32, %arg1: i32, %arg2: i32) -> (i32, i32) {
    %c0_i32 = arith.constant 0 : i32
    return %arg0, %arg1 : i32, i32
  }
}

</mosaic_0001>

<bundles_post_ra>
// kernel: tpu_custom_call.1
= control target key start
LH: loop header
LB: loop body
LE: loop exit
PB: predicated region body
PF: predicated region fallthrough
CT: control target
= control target key end

     0   :  { %9 = vsyncpa [#allocation3], 0  ;;  %s2354_s0 = inlined_call_operand.hbm [shape: bf16[512,256], index: 0, kind: input, shape index: {}]   ;;  %s2355_s1 = inlined_call_operand.hbm [shape: bf16[256,128], index: 1, kind: input, shape index: {}]   ;;  %s2356_s2 = inlined_call_operand.hbm [shape: f32[1,128], index: 2, kind: input, shape index: {}]   ;;  %s2357_s3 = inlined_call_operand.hbm [shape: f32[1,128], index: 3, kind: input, shape index: {}]   ;;  %s2358_s4 = inlined_call_operand.hbm [shape: bf16[512,128], index: 4, kind: output, shape index: {}]  }
   0x1   :  { %10 = vsyncpa [#allocation6], 0 }
   0x2   :  { %11 = vsyncpa [#allocation9], 0 }
   0x3   :  { %12 = vsyncpa [#allocation4], 0  ;;  %s2089_s15 = smov [#allocation5]   ;;  %s1971_s19 = scalar_lea.hbm %s2355_s1, 2048 }
   0x4   :  { %s30_s16 = sshll.u32 %s2089_s15, 4  ;;  %p1972_p0 = scmp.ne.s32.totalorder %s2355_s1, %s1971_s19  ;;  %s31_s16 = int_to_ptr.vmem [resolvable:$true] %s30_s16 }
   0x5   :  { %p1975_p1 = scmp.lt.u32.totalorder %s1971_s19, %s2355_s1 }
   0x7   :  { %p1977_p2 = pnand %p1975_p1, %p1972_p0 }
   0x9   :  { %1980 = shalt.err (!%p1977_p2)
}
   0xa   :  { %s1981_s24 = scalar_lea.vmem %s31_s16, 2048  ;;  %p1986_p4 = scmp.lt.s32.totalorder %s31_s16, %s31_s16 }
   0xb   :  { %p1982_p3 = scmp.ne.s32.totalorder %s31_s16, %s1981_s24  ;;  %p1987_p5 = scmp.lt.s32.totalorder %s1981_s24, %s1981_s24 }
   0xd   :  { %p1988_p6 = por %p1987_p5, %p1986_p4 }
   0xf   :  { %p1989_p7 = pnand %p1988_p6, %p1982_p3 }
  0x11   :  { %1992 = shalt.err (!%p1989_p7)
}
  0x12   :  { %s2090_s25 = smov 64   ;;  %s2091_s26 = smov 4  }
  0x13   :  { %36 = dma.hbm_to_vmem [thread:$0]  %s2355_s1, 2048, %s31_s16, [#allocation6], %s2090_s25, %s2090_s25, %s2091_s26  }
  0x14   :  { %s2092_s29 = smov [#allocation2]   ;;  %s1993_s7 = scalar_lea.hbm %s2354_s0, 8192 }
  0x15   :  { %s18_s30 = sshll.u32 %s2092_s29, 4  ;;  %p1994_p8 = scmp.ne.s32.totalorder %s2354_s0, %s1993_s7  ;;  %s19_s30 = int_to_ptr.vmem [resolvable:$true] %s18_s30 }
  0x16   :  { %p1997_p9 = scmp.lt.u32.totalorder %s1993_s7, %s2354_s0 }
  0x18   :  { %p1999_p10 = pnand %p1997_p9, %p1994_p8 }
  0x1a   :  { %2002 = shalt.err (!%p1999_p10)
}
  0x1b   :  { %s2003_s12 = scalar_lea.vmem %s19_s30, 8192  ;;  %p2008_p12 = scmp.lt.s32.totalorder %s19_s30, %s19_s30 }
  0x1c   :  { %p2004_p11 = scmp.ne.s32.totalorder %s19_s30, %s2003_s12  ;;  %p2009_p13 = scmp.lt.s32.totalorder %s2003_s12, %s2003_s12 }
  0x1e   :  { %p2010_p0 = por %p2009_p13, %p2008_p12 }
  0x20   :  { %p2011_p1 = pnand %p2010_p0, %p2004_p11 }
  0x22   :  { %2014 = shalt.err (!%p2011_p1)
}
  0x23   :  { %s2093_s1 = smov 128   ;;  %s2094_s13 = smov 8  }
  0x24   :  { %24 = dma.hbm_to_vmem [thread:$0]  %s2354_s0, 8192, %s19_s30, [#allocation3], %s2093_s1, %s2093_s1, %s2094_s13  }
  0x25   :  { %s2095_s16 = smov [#allocation7]   ;;  %s2096_s18 = smov [#allocation8]  }
  0x26   :  { %s43_s17 = sshll.u32 %s2095_s16, 4  ;;  %s53_s19 = sshll.u32 %s2096_s18, 4  ;;  %s44_s17 = int_to_ptr.vmem [resolvable:$true] %s43_s17  ;;  %s54_s19 = int_to_ptr.vmem [resolvable:$true] %s53_s19 }
  0x27   :  { %s2015_s22 = scalar_lea.hbm %s2356_s2, 16 }
  0x28   :  { %p2016_p2 = scmp.ne.s32.totalorder %s2356_s2, %s2015_s22  ;;  %p2019_p3 = scmp.lt.u32.totalorder %s2015_s22, %s2356_s2 }
  0x2a   :  { %p2021_p4 = pnand %p2019_p3, %p2016_p2 }
  0x2c   :  { %2024 = shalt.err (!%p2021_p4)
}
  0x2d   :  { %s2025_s0 = scalar_lea.vmem %s44_s17, 16  ;;  %s2029_s29 = scalar_lea.vmem %s44_s17, 32 }
  0x2e   :  { %p2026_p5 = scmp.ne.s32.totalorder %s44_s17, %s2025_s0  ;;  %p2030_p6 = scmp.lt.s32.totalorder %s44_s17, %s44_s17 }
  0x2f   :  { %p2031_p7 = scmp.lt.s32.totalorder %s2029_s29, %s2025_s0 }
  0x31   :  { %p2032_p8 = por %p2031_p7, %p2030_p6 }
  0x33   :  { %p2033_p9 = pnand %p2032_p8, %p2026_p5 }
  0x35   :  { %2036 = shalt.err (!%p2033_p9)
}
  0x36   :  { %46 = dma.hbm_to_vmem [thread:$0]  %s2356_s2, 16, %s44_s17, [#allocation6]  }
  0x37   :  { %s2037_s8 = scalar_lea.hbm %s2357_s3, 16 }
  0x38   :  { %p2038_p10 = scmp.ne.s32.totalorder %s2357_s3, %s2037_s8  ;;  %p2041_p11 = scmp.lt.u32.totalorder %s2037_s8, %s2357_s3 }
  0x3a   :  { %p2043_p12 = pnand %p2041_p11, %p2038_p10 }
  0x3c   :  { %2046 = shalt.err (!%p2043_p12)
}
  0x3d   :  { %s2047_s1 = scalar_lea.vmem %s54_s19, 16  ;;  %s2051_s13 = scalar_lea.vmem %s54_s19, 32 }
  0x3e   :  { %p2048_p13 = scmp.ne.s32.totalorder %s54_s19, %s2047_s1  ;;  %p2052_p0 = scmp.lt.s32.totalorder %s54_s19, %s54_s19 }
  0x3f   :  { %p2053_p1 = scmp.lt.s32.totalorder %s2051_s13, %s2047_s1 }
  0x41   :  { %p2054_p2 = por %p2053_p1, %p2052_p0 }
  0x43   :  { %p2055_p3 = pnand %p2054_p2, %p2048_p13 }
  0x45   :  { %2058 = shalt.err (!%p2055_p3)
}
  0x46   :  { %56 = dma.hbm_to_vmem [thread:$0]  %s2357_s3, 16, %s54_s19, [#allocation9]  }
  0x47   :  { %2081 = dma.done.wait [#allocation3], 8192  }
  0x48   :  { %2082 = vsyncadd [#allocation3], 4294959104 }
  0x49   :  { %2083 = dma.done.wait [#allocation6], 2064  }
  0x4a   :  { %2084 = vsyncadd [#allocation6], 4294965232 }
  0x4b   :  { %2085 = dma.done.wait [#allocation9], 16  }
  0x4c   :  { %2086 = vsyncadd [#allocation9], 4294967280  ;;  %v2097_v0 = vmov 0   ;;  %v1859_v1 = vld [vmem:[#allocation5] sm:$0xff]   ;;  %v1860_v2 = vld [vmem:[#allocation5 + $0x8] sm:$0xff]   ;;  %s2098_s3 = smov [#allocation10]  }
  0x4d   :  { %582 = vmatprep.subr.bf16.mxu0 %v2097_v0  ;;  %1817 = vmatprep.subr.bf16.mxu1 %v2097_v0  ;;  %v1861_v3 = vld [vmem:[#allocation5 + $0x10] sm:$0xff]   ;;  %v1862_v4 = vld [vmem:[#allocation5 + $0x18] sm:$0xff]   ;;  %v1863_v5 = vld [vmem:[#allocation5 + $0x20] sm:$0xff]   ;;  %s1402_s15 = sshll.u32 %s2098_s3, 4  ;;  %s1403_s15 = int_to_ptr.vmem [resolvable:$true] %s1402_s15 }
  0x4e   :  { %583 = vmatpush1.bf16.msra.mxu0 %v1859_v1  ;;  %1833 = vmatpush1.bf16.msra.mxu1 %v1859_v1  ;;  %v1877_v6 = vld [vmem:[#allocation2 + $0x4] ss:$8 sps:$4 sm:$0xff]   ;;  %v1865_v9 = vld [vmem:[#allocation5 + $0x30] sm:$0xff]   ;;  %v1866_v10 = vld [vmem:[#allocation5 + $0x38] sm:$0xff]   ;;  %s2059_s16 = scalar_lea.vmem %s1403_s15, 4096  ;;  %p2064_p5 = scmp.lt.s32.totalorder %s1403_s15, %s1403_s15 }
  0x4f   :  { %584 = vmatprep.subr.bf16.mxu0 %v2097_v0  ;;  %1818 = vmatprep.subr.bf16.mxu1 %v2097_v0  ;;  %v1864_v7 = vld [vmem:[#allocation5 + $0x28] sm:$0xff]   ;;  %v1867_v11 = vld [vmem:[#allocation5 + $0x40] sm:$0xff]   ;;  %v1869_v13 = vld [vmem:[#allocation5 + $0x50] sm:$0xff]   ;;  %p2060_p4 = scmp.ne.s32.totalorder %s1403_s15, %s2059_s16  ;;  %p2065_p6 = scmp.lt.s32.totalorder %s2059_s16, %s2059_s16 }
  0x50   :  { %v1880_v8 = vld [vmem:[#allocation2 + $0x104] ss:$8 sps:$4 sm:$0xff]   ;;  %614 = vmatprep.mubr.bf16.mxu0 %v1877_v6  ;;  %v1870_v14 = vld [vmem:[#allocation5 + $0x58] sm:$0xff]   ;;  %v1873_v17 = vld [vmem:[#allocation5 + $0x70] sm:$0xff]  }
  0x51   :  { %742 = vmatprep.mubr.bf16.mxu1 %v1880_v8  ;;  %v1868_v12 = vld [vmem:[#allocation5 + $0x48] sm:$0xff]   ;;  %v1871_v15 = vld [vmem:[#allocation5 + $0x60] sm:$0xff]   ;;  %v1874_v18 = vld [vmem:[#allocation5 + $0x78] sm:$0xff]   ;;  %p2066_p7 = por %p2065_p6, %p2064_p5 }
  0x52   :  { %585 = vmatpush1.bf16.msra.mxu0 %v1860_v2  ;;  %1834 = vmatpush1.bf16.msra.mxu1 %v1860_v2  ;;  %v1872_v16 = vld [vmem:[#allocation5 + $0x68] sm:$0xff]   ;;  %v1881_v21 = vld [vmem:[#allocation2 + $0x14] ss:$8 sps:$4 sm:$0xff]   ;;  %v1885_v23 = vld [vmem:[#allocation2 + $0x10] ss:$8 sps:$4 sm:$0xff]  }
  0x53   :  { %586 = vmatprep.subr.bf16.mxu0 %v2097_v0  ;;  %1819 = vmatprep.subr.bf16.mxu1 %v2097_v0  ;;  %v1875_v19 = vld [vmem:[#allocation2] ss:$8 sps:$4 sm:$0xff]   ;;  %v1883_v22 = vld [vmem:[#allocation2 + $0x114] ss:$8 sps:$4 sm:$0xff]   ;;  %v1886_v24 = vld [vmem:[#allocation2 + $0x110] ss:$8 sps:$4 sm:$0xff]   ;;  %p2067_p8 = pnand %p2066_p7, %p2060_p4 }
  0x54   :  { %v1878_v20 = vld [vmem:[#allocation2 + $0x100] ss:$8 sps:$4 sm:$0xff]   ;;  %v1887_v25 = vld [vmem:[#allocation2 + $0x24] ss:$8 sps:$4 sm:$0xff]   ;;  %v1893_v29 = vld [vmem:[#allocation2 + $0x34] ss:$8 sps:$4 sm:$0xff]  }
  0x55   :  { %v1889_v26 = vld [vmem:[#allocation2 + $0x124] ss:$8 sps:$4 sm:$0xff]   ;;  %v1891_v27 = vld [vmem:[#allocation2 + $0x20] ss:$8 sps:$4 sm:$0xff]   ;;  %v1895_v30 = vld [vmem:[#allocation2 + $0x134] ss:$8 sps:$4 sm:$0xff]  }
  0x56   :  { %587 = vmatpush1.bf16.msra.mxu0 %v1861_v3  ;;  %1835 = vmatpush1.bf16.msra.mxu1 %v1861_v3  ;;  %v1892_v28 = vld [vmem:[#allocation2 + $0x120] ss:$8 sps:$4 sm:$0xff]   ;;  %v1897_v31 = vld [vmem:[#allocation2 + $0x30] ss:$8 sps:$4 sm:$0xff]   ;;  %v1899_v33 = vld [vmem:[#allocation2 + $0x44] ss:$8 sps:$4 sm:$0xff]  }
  0x57   :  { %588 = vmatprep.subr.bf16.mxu0 %v2097_v0  ;;  %1820 = vmatprep.subr.bf16.mxu1 %v2097_v0  ;;  %v1898_v32 = vld [vmem:[#allocation2 + $0x130] ss:$8 sps:$4 sm:$0xff]   ;;  %v1901_v34 = vld [vmem:[#allocation2 + $0x144] ss:$8 sps:$4 sm:$0xff]   ;;  %v1903_v35 = vld [vmem:[#allocation2 + $0x40] ss:$8 sps:$4 sm:$0xff]  }
  0x58   :  { %v1904_v36 = vld [vmem:[#allocation2 + $0x140] ss:$8 sps:$4 sm:$0xff]   ;;  %v1905_v37 = vld [vmem:[#allocation2 + $0x54] ss:$8 sps:$4 sm:$0xff]   ;;  %v1909_v39 = vld [vmem:[#allocation2 + $0x50] ss:$8 sps:$4 sm:$0xff]  }
  0x59   :  { %v1907_v38 = vld [vmem:[#allocation2 + $0x154] ss:$8 sps:$4 sm:$0xff]   ;;  %v1910_v40 = vld [vmem:[#allocation2 + $0x150] ss:$8 sps:$4 sm:$0xff]   ;;  %v1911_v41 = vld [vmem:[#allocation2 + $0x64] ss:$8 sps:$4 sm:$0xff]  }
  0x5a   :  { %589 = vmatpush1.bf16.msra.mxu0 %v1862_v4  ;;  %1836 = vmatpush1.bf16.msra.mxu1 %v1862_v4  ;;  %v1913_v42 = vld [vmem:[#allocation2 + $0x164] ss:$8 sps:$4 sm:$0xff]   ;;  %v1915_v43 = vld [vmem:[#allocation2 + $0x60] ss:$8 sps:$4 sm:$0xff]   ;;  %v1917_v45 = vld [vmem:[#allocation2 + $0x74] ss:$8 sps:$4 sm:$0xff]  }
  0x5b   :  { %590 = vmatprep.subr.bf16.mxu0 %v2097_v0  ;;  %1821 = vmatprep.subr.bf16.mxu1 %v2097_v0  ;;  %v1916_v44 = vld [vmem:[#allocation2 + $0x160] ss:$8 sps:$4 sm:$0xff]   ;;  %v1919_v46 = vld [vmem:[#allocation2 + $0x174] ss:$8 sps:$4 sm:$0xff]   ;;  %v1921_v47 = vld [vmem:[#allocation2 + $0x70] ss:$8 sps:$4 sm:$0xff]  }
  0x5c   :  { %v1922_v48 = vld [vmem:[#allocation2 + $0x170] ss:$8 sps:$4 sm:$0xff]   ;;  %v1923_v49 = vld [vmem:[#allocation2 + $0x84] ss:$8 sps:$4 sm:$0xff]   ;;  %v1927_v51 = vld [vmem:[#allocation2 + $0x80] ss:$8 sps:$4 sm:$0xff]  }
  0x5d   :  { %v1925_v50 = vld [vmem:[#allocation2 + $0x184] ss:$8 sps:$4 sm:$0xff]   ;;  %v1928_v52 = vld [vmem:[#allocation2 + $0x180] ss:$8 sps:$4 sm:$0xff]   ;;  %v1929_v53 = vld [vmem:[#allocation2 + $0x94] ss:$8 sps:$4 sm:$0xff]  }
  0x5e   :  { %591 = vmatpush1.bf16.msra.mxu0 %v1863_v5  ;;  %1837 = vmatpush1.bf16.msra.mxu1 %v1863_v5  ;;  %v1931_v54 = vld [vmem:[#allocation2 + $0x194] ss:$8 sps:$4 sm:$0xff]   ;;  %v1933_v55 = vld [vmem:[#allocation2 + $0x90] ss:$8 sps:$4 sm:$0xff]   ;;  %v1935_v57 = vld [vmem:[#allocation2 + $0xa4] ss:$8 sps:$4 sm:$0xff]  }
  0x5f   :  { %592 = vmatprep.subr.bf16.mxu0 %v2097_v0  ;;  %1822 = vmatprep.subr.bf16.mxu1 %v2097_v0  ;;  %v1934_v56 = vld [vmem:[#allocation2 + $0x190] ss:$8 sps:$4 sm:$0xff]   ;;  %v1937_v58 = vld [vmem:[#allocation2 + $0x1a4] ss:$8 sps:$4 sm:$0xff]   ;;  %v1939_v59 = vld [vmem:[#allocation2 + $0xa0] ss:$8 sps:$4 sm:$0xff]  }
  0x60   :  { %v1940_v60 = vld [vmem:[#allocation2 + $0x1a0] ss:$8 sps:$4 sm:$0xff]   ;;  %v1941_v61 = vld [vmem:[#allocation2 + $0xb4] ss:$8 sps:$4 sm:$0xff]   ;;  %v1945_v63 = vld [vmem:[#allocation2 + $0xb0] ss:$8 sps:$4 sm:$0xff]  }
  0x61   :  { %v1943_v62 = vld [vmem:[#allocation2 + $0x1b4] ss:$8 sps:$4 sm:$0xff]   ;;  %v1947_v1 = vld [vmem:[#allocation2 + $0xc4] ss:$8 sps:$4 sm:$0xff]   ;;  %v1951_v3 = vld [vmem:[#allocation2 + $0xc0] ss:$8 sps:$4 sm:$0xff]  }
  0x62   :  { %593 = vmatpush1.bf16.msra.mxu0 %v1864_v7  ;;  %1838 = vmatpush1.bf16.msra.mxu1 %v1864_v7  ;;  %v1949_v2 = vld [vmem:[#allocation2 + $0x1c4] ss:$8 sps:$4 sm:$0xff]   ;;  %v1952_v4 = vld [vmem:[#allocation2 + $0x1c0] ss:$8 sps:$4 sm:$0xff]   ;;  %v1953_v5 = vld [vmem:[#allocation2 + $0xd4] ss:$8 sps:$4 sm:$0xff]  }
  0x63   :  { %594 = vmatprep.subr.bf16.mxu0 %v2097_v0  ;;  %1823 = vmatprep.subr.bf16.mxu1 %v2097_v0  ;;  %v1955_v6 = vld [vmem:[#allocation2 + $0x1d4] ss:$8 sps:$4 sm:$0xff]   ;;  %v1957_v7 = vld [vmem:[#allocation2 + $0xd0] ss:$8 sps:$4 sm:$0xff]  }
  0x64   :  { %v1958_v8 = vld [vmem:[#allocation2 + $0x1d0] ss:$8 sps:$4 sm:$0xff]  }
  0x66   :  { %595 = vmatpush1.bf16.msra.mxu0 %v1865_v9  ;;  %1839 = vmatpush1.bf16.msra.mxu1 %v1865_v9  ;;  %v1959_v9 = vld [vmem:[#allocation2 + $0xe4] ss:$8 sps:$4 sm:$0xff]  }
  0x67   :  { %596 = vmatprep.subr.bf16.mxu0 %v2097_v0  ;;  %1824 = vmatprep.subr.bf16.mxu1 %v2097_v0 }
  0x6a   :  { %597 = vmatpush1.bf16.msra.mxu0 %v1866_v10  ;;  %1840 = vmatpush1.bf16.msra.mxu1 %v1866_v10  ;;  %v1961_v10 = vld [vmem:[#allocation2 + $0x1e4] ss:$8 sps:$4 sm:$0xff]  }
  0x6b   :  { %598 = vmatprep.subr.bf16.mxu0 %v2097_v0  ;;  %1825 = vmatprep.subr.bf16.mxu1 %v2097_v0 }
  0x6e   :  { %599 = vmatpush1.bf16.msra.mxu0 %v1867_v11  ;;  %1841 = vmatpush1.bf16.msra.mxu1 %v1867_v11  ;;  %v1963_v11 = vld [vmem:[#allocation2 + $0xe0] ss:$8 sps:$4 sm:$0xff]  }
  0x6f   :  { %600 = vmatprep.subr.bf16.mxu0 %v2097_v0  ;;  %1826 = vmatprep.subr.bf16.mxu1 %v2097_v0 }
  0x72   :  { %601 = vmatpush1.bf16.msra.mxu0 %v1868_v12  ;;  %1842 = vmatpush1.bf16.msra.mxu1 %v1868_v12  ;;  %v1964_v12 = vld [vmem:[#allocation2 + $0x1e0] ss:$8 sps:$4 sm:$0xff]  }
  0x73   :  { %602 = vmatprep.subr.bf16.mxu0 %v2097_v0  ;;  %1827 = vmatprep.subr.bf16.mxu1 %v2097_v0 }
  0x76   :  { %603 = vmatpush1.bf16.msra.mxu0 %v1869_v13  ;;  %1843 = vmatpush1.bf16.msra.mxu1 %v1869_v13  ;;  %v1965_v13 = vld [vmem:[#allocation2 + $0xf4] ss:$8 sps:$4 sm:$0xff]  }
  0x77   :  { %604 = vmatprep.subr.bf16.mxu0 %v2097_v0  ;;  %1828 = vmatprep.subr.bf16.mxu1 %v2097_v0 }
  0x7a   :  { %605 = vmatpush1.bf16.msra.mxu0 %v1870_v14  ;;  %1844 = vmatpush1.bf16.msra.mxu1 %v1870_v14  ;;  %v1967_v14 = vld [vmem:[#allocation2 + $0x1f4] ss:$8 sps:$4 sm:$0xff]  }
  0x7b   :  { %606 = vmatprep.subr.bf16.mxu0 %v2097_v0  ;;  %1829 = vmatprep.subr.bf16.mxu1 %v2097_v0 }
  0x7e   :  { %607 = vmatpush1.bf16.msra.mxu0 %v1871_v15  ;;  %1845 = vmatpush1.bf16.msra.mxu1 %v1871_v15  ;;  %v1969_v15 = vld [vmem:[#allocation2 + $0xf0] ss:$8 sps:$4 sm:$0xff]  }
  0x7f   :  { %608 = vmatprep.subr.bf16.mxu0 %v2097_v0  ;;  %1830 = vmatprep.subr.bf16.mxu1 %v2097_v0 }
  0x82   :  { %609 = vmatpush1.bf16.msra.mxu0 %v1872_v16  ;;  %1846 = vmatpush1.bf16.msra.mxu1 %v1872_v16  ;;  %v1970_v16 = vld [vmem:[#allocation2 + $0x1f0] ss:$8 sps:$4 sm:$0xff]  }
  0x83   :  { %610 = vmatprep.subr.bf16.mxu0 %v2097_v0  ;;  %1831 = vmatprep.subr.bf16.mxu1 %v2097_v0 }
  0x86   :  { %611 = vmatpush1.bf16.msra.mxu0 %v1873_v17  ;;  %1847 = vmatpush1.bf16.msra.mxu1 %v1873_v17  ;;  %v2207_v17 = vld [vmem:[#allocation7] ss:$0 sm:$0xff] }
  0x87   :  { %612 = vmatprep.subr.bf16.mxu0 %v2097_v0  ;;  %1832 = vmatprep.subr.bf16.mxu1 %v2097_v0  ;;  %v1946_v0 = vld [vmem:[#allocation2 + $0x1b0] ss:$8 sps:$4 sm:$0xff]  }
  0x8a   :  { %613 = vmatpush1.bf16.msra.mxu0 %v1874_v18  ;;  %1848 = vmatpush1.bf16.msra.mxu1 %v1874_v18 }
  0x8d   :  { %615 = vmatmul.mubr.bf16.vlgmr.msra.gmra.mrb[0].mxu0 %v1875_v19  ;;  %743 = vmatmul.mubr.bf16.vlgmr.msra.gmra.mrb[0].mxu1 %v1878_v20  ;;  %v2209_v19 = vld [vmem:[#allocation8] ss:$0 sm:$0xff] }
  0x8e   :  { %622 = vmatprep.mubr.bf16.mxu0 %v1881_v21  ;;  %750 = vmatprep.mubr.bf16.mxu1 %v1883_v22 }
  0x95   :  { %623 = vmatmul.mubr.bf16.gmra.mrb[4].mxu0 %v1885_v23  ;;  %751 = vmatmul.mubr.bf16.gmra.mrb[4].mxu1 %v1886_v24 }
  0x96   :  { %630 = vmatprep.mubr.bf16.mxu0 %v1887_v25  ;;  %758 = vmatprep.mubr.bf16.mxu1 %v1889_v26 }
  0x9d   :  { %631 = vmatmul.mubr.bf16.gmra.mrb[8].mxu0 %v1891_v27  ;;  %759 = vmatmul.mubr.bf16.gmra.mrb[8].mxu1 %v1892_v28 }
  0x9e   :  { %638 = vmatprep.mubr.bf16.mxu0 %v1893_v29  ;;  %766 = vmatprep.mubr.bf16.mxu1 %v1895_v30 }
  0xa5   :  { %639 = vmatmul.mubr.bf16.gmra.mrb[12].mxu0 %v1897_v31  ;;  %767 = vmatmul.mubr.bf16.gmra.mrb[12].mxu1 %v1898_v32 }
  0xa6   :  { %646 = vmatprep.mubr.bf16.mxu0 %v1899_v33  ;;  %774 = vmatprep.mubr.bf16.mxu1 %v1901_v34 }
  0xad   :  { %647 = vmatmul.mubr.bf16.gmra.mrb[16].mxu0 %v1903_v35  ;;  %775 = vmatmul.mubr.bf16.gmra.mrb[16].mxu1 %v1904_v36 }
  0xae   :  { %654 = vmatprep.mubr.bf16.mxu0 %v1905_v37  ;;  %782 = vmatprep.mubr.bf16.mxu1 %v1907_v38 }
  0xb5   :  { %655 = vmatmul.mubr.bf16.gmra.mrb[20].mxu0 %v1909_v39  ;;  %783 = vmatmul.mubr.bf16.gmra.mrb[20].mxu1 %v1910_v40 }
  0xb6   :  { %662 = vmatprep.mubr.bf16.mxu0 %v1911_v41  ;;  %790 = vmatprep.mubr.bf16.mxu1 %v1913_v42 }
  0xbd   :  { %663 = vmatmul.mubr.bf16.gmra.mrb[24].mxu0 %v1915_v43  ;;  %791 = vmatmul.mubr.bf16.gmra.mrb[24].mxu1 %v1916_v44 }
  0xbe   :  { %670 = vmatprep.mubr.bf16.mxu0 %v1917_v45  ;;  %798 = vmatprep.mubr.bf16.mxu1 %v1919_v46 }
  0xc5   :  { %671 = vmatmul.mubr.bf16.gmra.mrb[28].mxu0 %v1921_v47  ;;  %799 = vmatmul.mubr.bf16.gmra.mrb[28].mxu1 %v1922_v48 }
  0xc6   :  { %678 = vmatprep.mubr.bf16.mxu0 %v1923_v49  ;;  %806 = vmatprep.mubr.bf16.mxu1 %v1925_v50 }
  0xcd   :  { %679 = vmatmul.mubr.bf16.gmra.mrb[32].mxu0 %v1927_v51  ;;  %807 = vmatmul.mubr.bf16.gmra.mrb[32].mxu1 %v1928_v52 }
  0xce   :  { %686 = vmatprep.mubr.bf16.mxu0 %v1929_v53  ;;  %814 = vmatprep.mubr.bf16.mxu1 %v1931_v54 }
  0xd5   :  { %687 = vmatmul.mubr.bf16.gmra.mrb[36].mxu0 %v1933_v55  ;;  %815 = vmatmul.mubr.bf16.gmra.mrb[36].mxu1 %v1934_v56 }
  0xd6   :  { %694 = vmatprep.mubr.bf16.mxu0 %v1935_v57  ;;  %822 = vmatprep.mubr.bf16.mxu1 %v1937_v58 }
  0xdd   :  { %695 = vmatmul.mubr.bf16.gmra.mrb[40].mxu0 %v1939_v59  ;;  %823 = vmatmul.mubr.bf16.gmra.mrb[40].mxu1 %v1940_v60 }
  0xde   :  { %702 = vmatprep.mubr.bf16.mxu0 %v1941_v61  ;;  %830 = vmatprep.mubr.bf16.mxu1 %v1943_v62 }
  0xe5   :  { %703 = vmatmul.mubr.bf16.gmra.mrb[44].mxu0 %v1945_v63  ;;  %831 = vmatmul.mubr.bf16.gmra.mrb[44].mxu1 %v1946_v0 }
  0xe6   :  { %710 = vmatprep.mubr.bf16.mxu0 %v1947_v1  ;;  %838 = vmatprep.mubr.bf16.mxu1 %v1949_v2 }
  0xed   :  { %711 = vmatmul.mubr.bf16.gmra.mrb[48].mxu0 %v1951_v3  ;;  %839 = vmatmul.mubr.bf16.gmra.mrb[48].mxu1 %v1952_v4 }
  0xee   :  { %718 = vmatprep.mubr.bf16.mxu0 %v1953_v5  ;;  %846 = vmatprep.mubr.bf16.mxu1 %v1955_v6 }
  0xf5   :  { %719 = vmatmul.mubr.bf16.gmra.mrb[52].mxu0 %v1957_v7  ;;  %847 = vmatmul.mubr.bf16.gmra.mrb[52].mxu1 %v1958_v8 }
  0xf6   :  { %726 = vmatprep.mubr.bf16.mxu0 %v1959_v9  ;;  %854 = vmatprep.mubr.bf16.mxu1 %v1961_v10 }
  0xfd   :  { %727 = vmatmul.mubr.bf16.gmra.mrb[56].mxu0 %v1963_v11  ;;  %855 = vmatmul.mubr.bf16.gmra.mrb[56].mxu1 %v1964_v12 }
  0xfe   :  { %734 = vmatprep.mubr.bf16.mxu0 %v1965_v13  ;;  %862 = vmatprep.mubr.bf16.mxu1 %v1967_v14 }
 0x105   :  { %735 = vmatmul.mubr.bf16.gmra.mrb[60].mxu0 %v1969_v15  ;;  %863 = vmatmul.mubr.bf16.gmra.mrb[60].mxu1 %v1970_v16 }
 0x160   :  { %v616_v18 = vpop.f32.mrb[0].mxu0  ;;  %v744_v20 = vpop.f32.mrb[0].mxu1 }
 0x161   :  { %v878_v21 = vmul.f32 %v2207_v17, %v616_v18  ;;  %v910_v22 = vmul.f32 %v2207_v17, %v744_v20  ;;  %v618_v23 = vpop.f32.mrb[1].mxu0  ;;  %v746_v24 = vpop.f32.mrb[1].mxu1 }
 0x162   :  { %v619_v25 = vpop.f32.mrb[2].mxu0  ;;  %v747_v26 = vpop.f32.mrb[2].mxu1 }
 0x163   :  { %v949_v27 = vadd.f32 %v2209_v19, %v878_v21  ;;  %v981_v28 = vadd.f32 %v2209_v19, %v910_v22  ;;  %v879_v29 = vmul.f32 %v2207_v17, %v619_v25  ;;  %v911_v30 = vmul.f32 %v2207_v17, %v747_v26  ;;  %v621_v31 = vpop.f32.mrb[3].mxu0  ;;  %v749_v32 = vpop.f32.mrb[3].mxu1 }
 0x165   :  { %v950_v33 = vadd.f32 %v2209_v19, %v879_v29  ;;  %v982_v34 = vadd.f32 %v2209_v19, %v911_v30  ;;  %v1013_v35 = vmax.f32 %v949_v27, 0.0  ;;  %v1045_v36 = vmax.f32 %v981_v28, 0.0 }
 0x167   :  { %v1014_v37 = vmax.f32 %v950_v33, 0.0  ;;  %v1046_v38 = vmax.f32 %v982_v34, 0.0 }
 0x168   :  { %v624_v39 = vpop.f32.mrb[4].mxu0  ;;  %v752_v40 = vpop.f32.mrb[4].mxu1 }
 0x169   :  { %v1629_v41 = vpack.c.bf16 %v1014_v37, %v1013_v35  ;;  %v1709_v42 = vpack.c.bf16 %v1046_v38, %v1045_v36  ;;  %v880_v43 = vmul.f32 %v2207_v17, %v624_v39  ;;  %v912_v44 = vmul.f32 %v2207_v17, %v752_v40  ;;  %v626_v45 = vpop.f32.mrb[5].mxu0  ;;  %v754_v46 = vpop.f32.mrb[5].mxu1 }
 0x16a   :  { %v627_v47 = vpop.f32.mrb[6].mxu0  ;;  %v755_v48 = vpop.f32.mrb[6].mxu1 }
 0x16b   :  { %1630 = vst [vmem:[#allocation10] sm:$0xff] %v1629_v41   ;;  %1801 = vst [vmem:[#allocation10 + $0x80] sm:$0xff] %v1709_v42   ;;  %v951_v49 = vadd.f32 %v2209_v19, %v880_v43  ;;  %v983_v50 = vadd.f32 %v2209_v19, %v912_v44  ;;  %v881_v51 = vmul.f32 %v2207_v17, %v627_v47  ;;  %v629_v53 = vpop.f32.mrb[7].mxu0  ;;  %v757_v54 = vpop.f32.mrb[7].mxu1 }
 0x16c   :  { %v913_v52 = vmul.f32 %v2207_v17, %v755_v48 }
 0x16d   :  { %v952_v55 = vadd.f32 %v2209_v19, %v881_v51  ;;  %v1015_v57 = vmax.f32 %v951_v49, 0.0  ;;  %v1047_v58 = vmax.f32 %v983_v50, 0.0 }
 0x16e   :  { %v984_v56 = vadd.f32 %v2209_v19, %v913_v52 }
 0x16f   :  { %v1016_v59 = vmax.f32 %v952_v55, 0.0 }
 0x170   :  { %v1048_v60 = vmax.f32 %v984_v56, 0.0  ;;  %v632_v61 = vpop.f32.mrb[8].mxu0  ;;  %v760_v62 = vpop.f32.mrb[8].mxu1 }
 0x171   :  { %v1634_v63 = vpack.c.bf16 %v1016_v59, %v1015_v57  ;;  %v882_v1 = vmul.f32 %v2207_v17, %v632_v61  ;;  %v914_v2 = vmul.f32 %v2207_v17, %v760_v62  ;;  %v634_v3 = vpop.f32.mrb[9].mxu0  ;;  %v762_v4 = vpop.f32.mrb[9].mxu1 }
 0x172   :  { %v1714_v0 = vpack.c.bf16 %v1048_v60, %v1047_v58  ;;  %v635_v5 = vpop.f32.mrb[10].mxu0  ;;  %v763_v6 = vpop.f32.mrb[10].mxu1 }
 0x173   :  { %1786 = vst [vmem:[#allocation10 + $0x8] sm:$0xff] %v1634_v63   ;;  %v953_v7 = vadd.f32 %v2209_v19, %v882_v1  ;;  %v985_v8 = vadd.f32 %v2209_v19, %v914_v2  ;;  %v883_v9 = vmul.f32 %v2207_v17, %v635_v5  ;;  %v915_v10 = vmul.f32 %v2207_v17, %v763_v6  ;;  %v637_v11 = vpop.f32.mrb[11].mxu0  ;;  %v765_v12 = vpop.f32.mrb[11].mxu1 }
 0x174   :  { %1802 = vst [vmem:[#allocation10 + $0x88] sm:$0xff] %v1714_v0  }
 0x175   :  { %v954_v13 = vadd.f32 %v2209_v19, %v883_v9  ;;  %v986_v14 = vadd.f32 %v2209_v19, %v915_v10  ;;  %v1017_v15 = vmax.f32 %v953_v7, 0.0  ;;  %v1049_v16 = vmax.f32 %v985_v8, 0.0 }
 0x177   :  { %v1018_v18 = vmax.f32 %v954_v13, 0.0  ;;  %v1050_v20 = vmax.f32 %v986_v14, 0.0 }
 0x178   :  { %v640_v21 = vpop.f32.mrb[12].mxu0  ;;  %v768_v22 = vpop.f32.mrb[12].mxu1 }
 0x179   :  { %v1639_v23 = vpack.c.bf16 %v1018_v18, %v1017_v15  ;;  %v1719_v24 = vpack.c.bf16 %v1050_v20, %v1049_v16  ;;  %v884_v25 = vmul.f32 %v2207_v17, %v640_v21  ;;  %v916_v26 = vmul.f32 %v2207_v17, %v768_v22  ;;  %v642_v27 = vpop.f32.mrb[13].mxu0  ;;  %v770_v28 = vpop.f32.mrb[13].mxu1 }
 0x17a   :  { %v643_v29 = vpop.f32.mrb[14].mxu0  ;;  %v771_v30 = vpop.f32.mrb[14].mxu1 }
 0x17b   :  { %1787 = vst [vmem:[#allocation10 + $0x10] sm:$0xff] %v1639_v23   ;;  %1803 = vst [vmem:[#allocation10 + $0x90] sm:$0xff] %v1719_v24   ;;  %v955_v31 = vadd.f32 %v2209_v19, %v884_v25  ;;  %v987_v32 = vadd.f32 %v2209_v19, %v916_v26  ;;  %v885_v33 = vmul.f32 %v2207_v17, %v643_v29  ;;  %v645_v35 = vpop.f32.mrb[15].mxu0  ;;  %v773_v36 = vpop.f32.mrb[15].mxu1 }
 0x17c   :  { %v917_v34 = vmul.f32 %v2207_v17, %v771_v30 }
 0x17d   :  { %v956_v37 = vadd.f32 %v2209_v19, %v885_v33  ;;  %v1019_v39 = vmax.f32 %v955_v31, 0.0  ;;  %v1051_v40 = vmax.f32 %v987_v32, 0.0 }
 0x17e   :  { %v988_v38 = vadd.f32 %v2209_v19, %v917_v34 }
 0x17f   :  { %v1020_v41 = vmax.f32 %v956_v37, 0.0 }
 0x180   :  { %v1052_v42 = vmax.f32 %v988_v38, 0.0  ;;  %v648_v43 = vpop.f32.mrb[16].mxu0  ;;  %v776_v44 = vpop.f32.mrb[16].mxu1 }
 0x181   :  { %v1644_v45 = vpack.c.bf16 %v1020_v41, %v1019_v39  ;;  %v886_v47 = vmul.f32 %v2207_v17, %v648_v43  ;;  %v918_v48 = vmul.f32 %v2207_v17, %v776_v44  ;;  %v650_v49 = vpop.f32.mrb[17].mxu0  ;;  %v778_v50 = vpop.f32.mrb[17].mxu1 }
 0x182   :  { %v1724_v46 = vpack.c.bf16 %v1052_v42, %v1051_v40  ;;  %v651_v51 = vpop.f32.mrb[18].mxu0  ;;  %v779_v52 = vpop.f32.mrb[18].mxu1 }
 0x183   :  { %1788 = vst [vmem:[#allocation10 + $0x18] sm:$0xff] %v1644_v45   ;;  %v957_v53 = vadd.f32 %v2209_v19, %v886_v47  ;;  %v989_v54 = vadd.f32 %v2209_v19, %v918_v48  ;;  %v887_v55 = vmul.f32 %v2207_v17, %v651_v51  ;;  %v919_v56 = vmul.f32 %v2207_v17, %v779_v52  ;;  %v653_v57 = vpop.f32.mrb[19].mxu0  ;;  %v781_v58 = vpop.f32.mrb[19].mxu1 }
 0x184   :  { %1804 = vst [vmem:[#allocation10 + $0x98] sm:$0xff] %v1724_v46  }
 0x185   :  { %v958_v59 = vadd.f32 %v2209_v19, %v887_v55  ;;  %v990_v60 = vadd.f32 %v2209_v19, %v919_v56  ;;  %v1021_v61 = vmax.f32 %v957_v53, 0.0  ;;  %v1053_v62 = vmax.f32 %v989_v54, 0.0 }
 0x187   :  { %v1022_v63 = vmax.f32 %v958_v59, 0.0  ;;  %v1054_v0 = vmax.f32 %v990_v60, 0.0 }
 0x188   :  { %v656_v1 = vpop.f32.mrb[20].mxu0  ;;  %v784_v2 = vpop.f32.mrb[20].mxu1 }
 0x189   :  { %v1649_v3 = vpack.c.bf16 %v1022_v63, %v1021_v61  ;;  %v1729_v4 = vpack.c.bf16 %v1054_v0, %v1053_v62  ;;  %v888_v5 = vmul.f32 %v2207_v17, %v656_v1  ;;  %v920_v6 = vmul.f32 %v2207_v17, %v784_v2  ;;  %v658_v7 = vpop.f32.mrb[21].mxu0  ;;  %v786_v8 = vpop.f32.mrb[21].mxu1 }
 0x18a   :  { %v659_v9 = vpop.f32.mrb[22].mxu0  ;;  %v787_v10 = vpop.f32.mrb[22].mxu1 }
 0x18b   :  { %1789 = vst [vmem:[#allocation10 + $0x20] sm:$0xff] %v1649_v3   ;;  %1805 = vst [vmem:[#allocation10 + $0xa0] sm:$0xff] %v1729_v4   ;;  %v959_v11 = vadd.f32 %v2209_v19, %v888_v5  ;;  %v991_v12 = vadd.f32 %v2209_v19, %v920_v6  ;;  %v889_v13 = vmul.f32 %v2207_v17, %v659_v9  ;;  %v661_v15 = vpop.f32.mrb[23].mxu0  ;;  %v789_v16 = vpop.f32.mrb[23].mxu1 }
 0x18c   :  { %v921_v14 = vmul.f32 %v2207_v17, %v787_v10 }
 0x18d   :  { %v960_v18 = vadd.f32 %v2209_v19, %v889_v13  ;;  %v1023_v21 = vmax.f32 %v959_v11, 0.0  ;;  %v1055_v22 = vmax.f32 %v991_v12, 0.0 }
 0x18e   :  { %v992_v20 = vadd.f32 %v2209_v19, %v921_v14 }
 0x18f   :  { %v1024_v23 = vmax.f32 %v960_v18, 0.0 }
 0x190   :  { %v1056_v24 = vmax.f32 %v992_v20, 0.0  ;;  %v664_v25 = vpop.f32.mrb[24].mxu0  ;;  %v792_v26 = vpop.f32.mrb[24].mxu1 }
 0x191   :  { %v1654_v27 = vpack.c.bf16 %v1024_v23, %v1023_v21  ;;  %v890_v29 = vmul.f32 %v2207_v17, %v664_v25  ;;  %v922_v30 = vmul.f32 %v2207_v17, %v792_v26  ;;  %v666_v31 = vpop.f32.mrb[25].mxu0  ;;  %v794_v32 = vpop.f32.mrb[25].mxu1 }
 0x192   :  { %v1734_v28 = vpack.c.bf16 %v1056_v24, %v1055_v22  ;;  %v667_v33 = vpop.f32.mrb[26].mxu0  ;;  %v795_v34 = vpop.f32.mrb[26].mxu1 }
 0x193   :  { %1790 = vst [vmem:[#allocation10 + $0x28] sm:$0xff] %v1654_v27   ;;  %v961_v35 = vadd.f32 %v2209_v19, %v890_v29  ;;  %v993_v36 = vadd.f32 %v2209_v19, %v922_v30  ;;  %v891_v37 = vmul.f32 %v2207_v17, %v667_v33  ;;  %v923_v38 = vmul.f32 %v2207_v17, %v795_v34  ;;  %v669_v39 = vpop.f32.mrb[27].mxu0  ;;  %v797_v40 = vpop.f32.mrb[27].mxu1 }
 0x194   :  { %1806 = vst [vmem:[#allocation10 + $0xa8] sm:$0xff] %v1734_v28  }
 0x195   :  { %v962_v41 = vadd.f32 %v2209_v19, %v891_v37  ;;  %v994_v42 = vadd.f32 %v2209_v19, %v923_v38  ;;  %v1025_v43 = vmax.f32 %v961_v35, 0.0  ;;  %v1057_v44 = vmax.f32 %v993_v36, 0.0 }
 0x197   :  { %v1026_v45 = vmax.f32 %v962_v41, 0.0  ;;  %v1058_v46 = vmax.f32 %v994_v42, 0.0 }
 0x198   :  { %v672_v47 = vpop.f32.mrb[28].mxu0  ;;  %v800_v48 = vpop.f32.mrb[28].mxu1 }
 0x199   :  { %v1659_v49 = vpack.c.bf16 %v1026_v45, %v1025_v43  ;;  %v1739_v50 = vpack.c.bf16 %v1058_v46, %v1057_v44  ;;  %v892_v51 = vmul.f32 %v2207_v17, %v672_v47  ;;  %v924_v52 = vmul.f32 %v2207_v17, %v800_v48  ;;  %v674_v53 = vpop.f32.mrb[29].mxu0  ;;  %v802_v54 = vpop.f32.mrb[29].mxu1 }
 0x19a   :  { %v675_v55 = vpop.f32.mrb[30].mxu0  ;;  %v803_v56 = vpop.f32.mrb[30].mxu1 }
 0x19b   :  { %1791 = vst [vmem:[#allocation10 + $0x30] sm:$0xff] %v1659_v49   ;;  %1807 = vst [vmem:[#allocation10 + $0xb0] sm:$0xff] %v1739_v50   ;;  %v963_v57 = vadd.f32 %v2209_v19, %v892_v51  ;;  %v995_v58 = vadd.f32 %v2209_v19, %v924_v52  ;;  %v893_v59 = vmul.f32 %v2207_v17, %v675_v55  ;;  %v677_v61 = vpop.f32.mrb[31].mxu0  ;;  %v805_v62 = vpop.f32.mrb[31].mxu1 }
 0x19c   :  { %v925_v60 = vmul.f32 %v2207_v17, %v803_v56 }
 0x19d   :  { %v964_v63 = vadd.f32 %v2209_v19, %v893_v59  ;;  %v1027_v1 = vmax.f32 %v963_v57, 0.0  ;;  %v1059_v2 = vmax.f32 %v995_v58, 0.0 }
 0x19e   :  { %v996_v0 = vadd.f32 %v2209_v19, %v925_v60 }
 0x19f   :  { %v1028_v3 = vmax.f32 %v964_v63, 0.0 }
 0x1a0   :  { %v1060_v4 = vmax.f32 %v996_v0, 0.0  ;;  %v680_v5 = vpop.f32.mrb[32].mxu0  ;;  %v808_v6 = vpop.f32.mrb[32].mxu1 }
 0x1a1   :  { %v1664_v7 = vpack.c.bf16 %v1028_v3, %v1027_v1  ;;  %v894_v9 = vmul.f32 %v2207_v17, %v680_v5  ;;  %v926_v10 = vmul.f32 %v2207_v17, %v808_v6  ;;  %v682_v11 = vpop.f32.mrb[33].mxu0  ;;  %v810_v12 = vpop.f32.mrb[33].mxu1 }
 0x1a2   :  { %v1744_v8 = vpack.c.bf16 %v1060_v4, %v1059_v2  ;;  %v683_v13 = vpop.f32.mrb[34].mxu0  ;;  %v811_v14 = vpop.f32.mrb[34].mxu1 }
 0x1a3   :  { %1792 = vst [vmem:[#allocation10 + $0x38] sm:$0xff] %v1664_v7   ;;  %v965_v15 = vadd.f32 %v2209_v19, %v894_v9  ;;  %v997_v16 = vadd.f32 %v2209_v19, %v926_v10  ;;  %v895_v18 = vmul.f32 %v2207_v17, %v683_v13  ;;  %v927_v20 = vmul.f32 %v2207_v17, %v811_v14  ;;  %v685_v21 = vpop.f32.mrb[35].mxu0  ;;  %v813_v22 = vpop.f32.mrb[35].mxu1 }
 0x1a4   :  { %1808 = vst [vmem:[#allocation10 + $0xb8] sm:$0xff] %v1744_v8  }
 0x1a5   :  { %v966_v23 = vadd.f32 %v2209_v19, %v895_v18  ;;  %v998_v24 = vadd.f32 %v2209_v19, %v927_v20  ;;  %v1029_v25 = vmax.f32 %v965_v15, 0.0  ;;  %v1061_v26 = vmax.f32 %v997_v16, 0.0 }
 0x1a7   :  { %v1030_v27 = vmax.f32 %v966_v23, 0.0  ;;  %v1062_v28 = vmax.f32 %v998_v24, 0.0 }
 0x1a8   :  { %v688_v29 = vpop.f32.mrb[36].mxu0  ;;  %v816_v30 = vpop.f32.mrb[36].mxu1 }
 0x1a9   :  { %v1669_v31 = vpack.c.bf16 %v1030_v27, %v1029_v25  ;;  %v1749_v32 = vpack.c.bf16 %v1062_v28, %v1061_v26  ;;  %v896_v33 = vmul.f32 %v2207_v17, %v688_v29  ;;  %v928_v34 = vmul.f32 %v2207_v17, %v816_v30  ;;  %v690_v35 = vpop.f32.mrb[37].mxu0  ;;  %v818_v36 = vpop.f32.mrb[37].mxu1 }
 0x1aa   :  { %v691_v37 = vpop.f32.mrb[38].mxu0  ;;  %v819_v38 = vpop.f32.mrb[38].mxu1 }
 0x1ab   :  { %1793 = vst [vmem:[#allocation10 + $0x40] sm:$0xff] %v1669_v31   ;;  %1809 = vst [vmem:[#allocation10 + $0xc0] sm:$0xff] %v1749_v32   ;;  %v967_v39 = vadd.f32 %v2209_v19, %v896_v33  ;;  %v999_v40 = vadd.f32 %v2209_v19, %v928_v34  ;;  %v897_v41 = vmul.f32 %v2207_v17, %v691_v37  ;;  %v693_v43 = vpop.f32.mrb[39].mxu0  ;;  %v821_v44 = vpop.f32.mrb[39].mxu1 }
 0x1ac   :  { %v929_v42 = vmul.f32 %v2207_v17, %v819_v38 }
 0x1ad   :  { %v968_v45 = vadd.f32 %v2209_v19, %v897_v41  ;;  %v1031_v47 = vmax.f32 %v967_v39, 0.0  ;;  %v1063_v48 = vmax.f32 %v999_v40, 0.0 }
 0x1ae   :  { %v1000_v46 = vadd.f32 %v2209_v19, %v929_v42 }
 0x1af   :  { %v1032_v49 = vmax.f32 %v968_v45, 0.0 }
 0x1b0   :  { %v1064_v50 = vmax.f32 %v1000_v46, 0.0  ;;  %v696_v51 = vpop.f32.mrb[40].mxu0  ;;  %v824_v52 = vpop.f32.mrb[40].mxu1 }
 0x1b1   :  { %v1674_v53 = vpack.c.bf16 %v1032_v49, %v1031_v47  ;;  %v898_v55 = vmul.f32 %v2207_v17, %v696_v51  ;;  %v930_v56 = vmul.f32 %v2207_v17, %v824_v52  ;;  %v698_v57 = vpop.f32.mrb[41].mxu0  ;;  %v826_v58 = vpop.f32.mrb[41].mxu1 }
 0x1b2   :  { %v1754_v54 = vpack.c.bf16 %v1064_v50, %v1063_v48  ;;  %v699_v59 = vpop.f32.mrb[42].mxu0  ;;  %v827_v60 = vpop.f32.mrb[42].mxu1 }
 0x1b3   :  { %1794 = vst [vmem:[#allocation10 + $0x48] sm:$0xff] %v1674_v53   ;;  %v969_v61 = vadd.f32 %v2209_v19, %v898_v55  ;;  %v1001_v62 = vadd.f32 %v2209_v19, %v930_v56  ;;  %v899_v63 = vmul.f32 %v2207_v17, %v699_v59  ;;  %v931_v0 = vmul.f32 %v2207_v17, %v827_v60  ;;  %v701_v1 = vpop.f32.mrb[43].mxu0  ;;  %v829_v2 = vpop.f32.mrb[43].mxu1 }
 0x1b4   :  { %1810 = vst [vmem:[#allocation10 + $0xc8] sm:$0xff] %v1754_v54  }
 0x1b5   :  { %v970_v3 = vadd.f32 %v2209_v19, %v899_v63  ;;  %v1002_v4 = vadd.f32 %v2209_v19, %v931_v0  ;;  %v1033_v5 = vmax.f32 %v969_v61, 0.0  ;;  %v1065_v6 = vmax.f32 %v1001_v62, 0.0 }
 0x1b7   :  { %v1034_v7 = vmax.f32 %v970_v3, 0.0  ;;  %v1066_v8 = vmax.f32 %v1002_v4, 0.0 }
 0x1b8   :  { %v704_v9 = vpop.f32.mrb[44].mxu0  ;;  %v832_v10 = vpop.f32.mrb[44].mxu1 }
 0x1b9   :  { %v1679_v11 = vpack.c.bf16 %v1034_v7, %v1033_v5  ;;  %v1759_v12 = vpack.c.bf16 %v1066_v8, %v1065_v6  ;;  %v900_v13 = vmul.f32 %v2207_v17, %v704_v9  ;;  %v932_v14 = vmul.f32 %v2207_v17, %v832_v10  ;;  %v706_v15 = vpop.f32.mrb[45].mxu0  ;;  %v834_v16 = vpop.f32.mrb[45].mxu1 }
 0x1ba   :  { %v707_v18 = vpop.f32.mrb[46].mxu0  ;;  %v835_v20 = vpop.f32.mrb[46].mxu1 }
 0x1bb   :  { %1795 = vst [vmem:[#allocation10 + $0x50] sm:$0xff] %v1679_v11   ;;  %1811 = vst [vmem:[#allocation10 + $0xd0] sm:$0xff] %v1759_v12   ;;  %v971_v21 = vadd.f32 %v2209_v19, %v900_v13  ;;  %v1003_v22 = vadd.f32 %v2209_v19, %v932_v14  ;;  %v901_v23 = vmul.f32 %v2207_v17, %v707_v18  ;;  %v709_v25 = vpop.f32.mrb[47].mxu0  ;;  %v837_v26 = vpop.f32.mrb[47].mxu1 }
 0x1bc   :  { %v933_v24 = vmul.f32 %v2207_v17, %v835_v20 }
 0x1bd   :  { %v972_v27 = vadd.f32 %v2209_v19, %v901_v23  ;;  %v1035_v29 = vmax.f32 %v971_v21, 0.0  ;;  %v1067_v30 = vmax.f32 %v1003_v22, 0.0 }
 0x1be   :  { %v1004_v28 = vadd.f32 %v2209_v19, %v933_v24 }
 0x1bf   :  { %v1036_v31 = vmax.f32 %v972_v27, 0.0 }
 0x1c0   :  { %v1068_v32 = vmax.f32 %v1004_v28, 0.0  ;;  %v712_v33 = vpop.f32.mrb[48].mxu0  ;;  %v840_v34 = vpop.f32.mrb[48].mxu1 }
 0x1c1   :  { %v1684_v35 = vpack.c.bf16 %v1036_v31, %v1035_v29  ;;  %v902_v37 = vmul.f32 %v2207_v17, %v712_v33  ;;  %v934_v38 = vmul.f32 %v2207_v17, %v840_v34  ;;  %v714_v39 = vpop.f32.mrb[49].mxu0  ;;  %v842_v40 = vpop.f32.mrb[49].mxu1 }
 0x1c2   :  { %v1764_v36 = vpack.c.bf16 %v1068_v32, %v1067_v30  ;;  %v715_v41 = vpop.f32.mrb[50].mxu0  ;;  %v843_v42 = vpop.f32.mrb[50].mxu1 }
 0x1c3   :  { %1796 = vst [vmem:[#allocation10 + $0x58] sm:$0xff] %v1684_v35   ;;  %v973_v43 = vadd.f32 %v2209_v19, %v902_v37  ;;  %v1005_v44 = vadd.f32 %v2209_v19, %v934_v38  ;;  %v903_v45 = vmul.f32 %v2207_v17, %v715_v41  ;;  %v935_v46 = vmul.f32 %v2207_v17, %v843_v42  ;;  %v717_v47 = vpop.f32.mrb[51].mxu0  ;;  %v845_v48 = vpop.f32.mrb[51].mxu1 }
 0x1c4   :  { %1812 = vst [vmem:[#allocation10 + $0xd8] sm:$0xff] %v1764_v36  }
 0x1c5   :  { %v974_v49 = vadd.f32 %v2209_v19, %v903_v45  ;;  %v1006_v50 = vadd.f32 %v2209_v19, %v935_v46  ;;  %v1037_v51 = vmax.f32 %v973_v43, 0.0  ;;  %v1069_v52 = vmax.f32 %v1005_v44, 0.0 }
 0x1c7   :  { %v1038_v53 = vmax.f32 %v974_v49, 0.0  ;;  %v1070_v54 = vmax.f32 %v1006_v50, 0.0 }
 0x1c8   :  { %v720_v55 = vpop.f32.mrb[52].mxu0  ;;  %v848_v56 = vpop.f32.mrb[52].mxu1 }
 0x1c9   :  { %v1689_v57 = vpack.c.bf16 %v1038_v53, %v1037_v51  ;;  %v1769_v58 = vpack.c.bf16 %v1070_v54, %v1069_v52  ;;  %v904_v59 = vmul.f32 %v2207_v17, %v720_v55  ;;  %v936_v60 = vmul.f32 %v2207_v17, %v848_v56  ;;  %v722_v61 = vpop.f32.mrb[53].mxu0  ;;  %v850_v62 = vpop.f32.mrb[53].mxu1 }
 0x1ca   :  { %v723_v63 = vpop.f32.mrb[54].mxu0  ;;  %v851_v0 = vpop.f32.mrb[54].mxu1 }
 0x1cb   :  { %1797 = vst [vmem:[#allocation10 + $0x60] sm:$0xff] %v1689_v57   ;;  %1813 = vst [vmem:[#allocation10 + $0xe0] sm:$0xff] %v1769_v58   ;;  %v975_v1 = vadd.f32 %v2209_v19, %v904_v59  ;;  %v1007_v2 = vadd.f32 %v2209_v19, %v936_v60  ;;  %v905_v3 = vmul.f32 %v2207_v17, %v723_v63  ;;  %v725_v5 = vpop.f32.mrb[55].mxu0  ;;  %v853_v6 = vpop.f32.mrb[55].mxu1 }
 0x1cc   :  { %v937_v4 = vmul.f32 %v2207_v17, %v851_v0 }
 0x1cd   :  { %v976_v7 = vadd.f32 %v2209_v19, %v905_v3  ;;  %v1039_v9 = vmax.f32 %v975_v1, 0.0  ;;  %v1071_v10 = vmax.f32 %v1007_v2, 0.0 }
 0x1ce   :  { %v1008_v8 = vadd.f32 %v2209_v19, %v937_v4 }
 0x1cf   :  { %v1040_v11 = vmax.f32 %v976_v7, 0.0 }
 0x1d0   :  { %v1072_v12 = vmax.f32 %v1008_v8, 0.0  ;;  %v728_v13 = vpop.f32.mrb[56].mxu0  ;;  %v856_v14 = vpop.f32.mrb[56].mxu1 }
 0x1d1   :  { %v1694_v15 = vpack.c.bf16 %v1040_v11, %v1039_v9  ;;  %v906_v18 = vmul.f32 %v2207_v17, %v728_v13  ;;  %v938_v20 = vmul.f32 %v2207_v17, %v856_v14  ;;  %v730_v21 = vpop.f32.mrb[57].mxu0  ;;  %v858_v22 = vpop.f32.mrb[57].mxu1 }
 0x1d2   :  { %v1774_v16 = vpack.c.bf16 %v1072_v12, %v1071_v10  ;;  %v731_v23 = vpop.f32.mrb[58].mxu0  ;;  %v859_v24 = vpop.f32.mrb[58].mxu1 }
 0x1d3   :  { %1798 = vst [vmem:[#allocation10 + $0x68] sm:$0xff] %v1694_v15   ;;  %v977_v25 = vadd.f32 %v2209_v19, %v906_v18  ;;  %v1009_v26 = vadd.f32 %v2209_v19, %v938_v20  ;;  %v907_v27 = vmul.f32 %v2207_v17, %v731_v23  ;;  %v939_v28 = vmul.f32 %v2207_v17, %v859_v24  ;;  %v733_v29 = vpop.f32.mrb[59].mxu0  ;;  %v861_v30 = vpop.f32.mrb[59].mxu1 }
 0x1d4   :  { %1814 = vst [vmem:[#allocation10 + $0xe8] sm:$0xff] %v1774_v16  }
 0x1d5   :  { %v978_v31 = vadd.f32 %v2209_v19, %v907_v27  ;;  %v1010_v32 = vadd.f32 %v2209_v19, %v939_v28  ;;  %v1041_v33 = vmax.f32 %v977_v25, 0.0  ;;  %v1073_v34 = vmax.f32 %v1009_v26, 0.0 }
 0x1d7   :  { %v1042_v35 = vmax.f32 %v978_v31, 0.0  ;;  %v1074_v36 = vmax.f32 %v1010_v32, 0.0 }
 0x1d8   :  { %v736_v37 = vpop.f32.mrb[60].mxu0  ;;  %v864_v38 = vpop.f32.mrb[60].mxu1 }
 0x1d9   :  { %v1699_v39 = vpack.c.bf16 %v1042_v35, %v1041_v33  ;;  %v1779_v40 = vpack.c.bf16 %v1074_v36, %v1073_v34  ;;  %v908_v41 = vmul.f32 %v2207_v17, %v736_v37  ;;  %v940_v42 = vmul.f32 %v2207_v17, %v864_v38  ;;  %v738_v43 = vpop.f32.mrb[61].mxu0  ;;  %v866_v44 = vpop.f32.mrb[61].mxu1 }
 0x1da   :  { %v739_v45 = vpop.f32.mrb[62].mxu0  ;;  %v867_v46 = vpop.f32.mrb[62].mxu1 }
 0x1db   :  { %1799 = vst [vmem:[#allocation10 + $0x70] sm:$0xff] %v1699_v39   ;;  %1815 = vst [vmem:[#allocation10 + $0xf0] sm:$0xff] %v1779_v40   ;;  %v979_v47 = vadd.f32 %v2209_v19, %v908_v41  ;;  %v1011_v48 = vadd.f32 %v2209_v19, %v940_v42  ;;  %v909_v49 = vmul.f32 %v2207_v17, %v739_v45  ;;  %v741_v51 = vpop.f32.mrb[63].mxu0  ;;  %v869_v52 = vpop.f32.mrb[63].mxu1 }
 0x1dc   :  { %v941_v50 = vmul.f32 %v2207_v17, %v867_v46 }
 0x1dd   :  { %v980_v53 = vadd.f32 %v2209_v19, %v909_v49  ;;  %v1043_v55 = vmax.f32 %v979_v47, 0.0  ;;  %v1075_v56 = vmax.f32 %v1011_v48, 0.0 }
 0x1de   :  { %v1012_v54 = vadd.f32 %v2209_v19, %v941_v50 }
 0x1df   :  { %v1044_v57 = vmax.f32 %v980_v53, 0.0 }
 0x1e0   :  { %v1076_v58 = vmax.f32 %v1012_v54, 0.0 }
 0x1e1   :  { %v1704_v59 = vpack.c.bf16 %v1044_v57, %v1043_v55 }
 0x1e2   :  { %v1784_v60 = vpack.c.bf16 %v1076_v58, %v1075_v56 }
 0x1e3   :  { %1800 = vst [vmem:[#allocation10 + $0x78] sm:$0xff] %v1704_v59  }
 0x1e4   :  { %1816 = vst [vmem:[#allocation10 + $0xf8] sm:$0xff] %v1784_v60  }
 0x1e5   :  { %2070 = shalt.err (!%p2067_p8)
}
 0x1e6   :  { %s2071_s19 = scalar_lea.hbm %s2358_s4, 4096 }
 0x1e7   :  { %p2072_p9 = scmp.ne.s32.totalorder %s2358_s4, %s2071_s19  ;;  %p2075_p10 = scmp.lt.u32.totalorder %s2071_s19, %s2358_s4 }
 0x1e9   :  { %p2077_p11 = pnand %p2075_p10, %p2072_p9 }
 0x1eb   :  { %2080 = shalt.err (!%p2077_p11)
}
 0x1ec   :  { %1408 = dma.vmem_to_hbm [thread:$0]  %s1403_s15, 4096, %s2358_s4, [#allocation4], %s2090_s25, %s2090_s25, %s2091_s26  }
 0x1ed   :  { %2087 = dma.done.wait [#allocation4], 4096  }
 0x1ee   :  { %2088 = vsyncadd [#allocation4], 4294963200 }
 0x1ef   :  { %1412 = vsyncpa [#allocation3], 1 }
 0x1f0   :  { %1413 = vsyncpa [#allocation6], 1 }
 0x1f1   :  { %1414 = vsyncpa [#allocation9], 1 }
 0x1f2   :  { %1415 = vsyncpa [#allocation4], 1 }

</bundles_post_ra>
